<compile_context>
chip_gen: v7x
topology: tpu7x:2x2x1
jax: 0.10.0
libtpu: 0.0.40
codegen_flags: <defaults>
</compile_context>

<pallas_src>
import functools

import jax
import jax.numpy as jnp
from jax.experimental import pallas as pl
from jax.experimental.pallas import tpu as pltpu

_LANE = 128
_TARGET_BLOCK_BYTES = 2 * 1024 * 1024   # ~2 MiB blocks: >=85% of HBM roofline
_FUSED_VMEM_FRACTION = 0.6              # array + temps budget for fused path
_FUSED_BYTES_PER_ELEM = 12              # in + out + f32 temp (worst case)


def _sublane(dtype) -> int:
    # f32 -> 8 rows per vreg, bf16/f16 -> 16, int8/fp8 -> 32.
    return {4: 8, 2: 16, 1: 32}.get(jnp.dtype(dtype).itemsize, 8)


def _round_up(x: int, m: int) -> int:
    return (x + m - 1) // m * m


@functools.lru_cache(maxsize=None)
def _vmem_capacity_bytes() -> int:
    """Generation-aware VMEM capacity (128 MiB v5e/v6e, 64 MiB v7x)."""
    try:
        cap = int(pltpu.get_tpu_info().vmem_capacity_bytes)
        if cap > 0:
            return cap
    except Exception:
        pass
    return 64 * 1024 * 1024   # conservative fallback (v7x per-TC)


# -----------------------------------------------------------------------------
# Fused path: the whole array is a single VMEM block (block == full dims, so
# no (8,128) alignment requirement and no padding).
# -----------------------------------------------------------------------------
def _normalize_fused_kernel(x_ref, o_ref):
    x = x_ref[...]
    m = jnp.max(jnp.abs(x)).astype(jnp.float32)     # exact in native dtype
    inv = 1.0 / m                                   # one scalar divide
    if x.dtype == jnp.float32:
        o_ref[...] = x * inv                        # reciprocal-multiply
    else:
        o_ref[...] = (x.astype(jnp.float32) * inv).astype(o_ref.dtype)


def _normalize_fused(dat):
    C, T = dat.shape
    vmem_cap = _vmem_capacity_bytes()
    return pl.pallas_call(
        _normalize_fused_kernel,
        out_shape=jax.ShapeDtypeStruct((C, T), dat.dtype),
        in_specs=[pl.BlockSpec((C, T), lambda: (0, 0))],
        out_specs=pl.BlockSpec((C, T), lambda: (0, 0)),
        compiler_params=pltpu.CompilerParams(
            vmem_limit_bytes=int(vmem_cap * 0.8)),
    )(dat)


# -----------------------------------------------------------------------------
# Tiled path: pass 1 = global abs-max reduction (partials per C block),
#             pass 2 = elementwise scale by the SMEM scalar reciprocal.
# -----------------------------------------------------------------------------
def _absmax_kernel(x_ref, m_ref, *, C, T, tile_c, tile_t, mask_c, mask_t):
    t = pl.program_id(1)

    @pl.when(t == 0)
    def _():
        m_ref[...] = jnp.zeros_like(m_ref)

    a = jnp.abs(x_ref[...])                         # native dtype, exact
    if mask_c or mask_t:
        # Ragged last block(s): out-of-bounds input values are unspecified,
        # so zero them out before the max (avoids NaN/garbage propagation).
        c = pl.program_id(0)
        shape = (tile_c, tile_t)
        valid = None
        if mask_c:
            row = jax.lax.broadcasted_iota(jnp.int32, shape, 0) + c * tile_c
            valid = row < C
        if mask_t:
            col = jax.lax.broadcasted_iota(jnp.int32, shape, 1) + t * tile_t
            vt = col < T
            valid = vt if valid is None else (valid & vt)
        a = jnp.where(valid, a, jnp.zeros_like(a))

    blk = jnp.max(a).astype(jnp.float32)            # scalar block abs-max
    m_ref[...] = jnp.maximum(m_ref[...], blk)


def _scale_kernel(inv_ref, x_ref, o_ref):
    inv = inv_ref[0]                                # f32 scalar from SMEM
    x = x_ref[...]
    if x.dtype == jnp.float32:
        o_ref[...] = x * inv                        # reciprocal-multiply
    else:
        o_ref[...] = (x.astype(jnp.float32) * inv).astype(o_ref.dtype)


def _choose_tiles(C, T, itemsize, sl):
    """~2 MiB lane-dense blocks; favor a wide T tile for skinny-C inputs."""
    Tp = _round_up(T, _LANE)
    max_t = max(_LANE, (_TARGET_BLOCK_BYTES // (sl * itemsize)) // _LANE * _LANE)
    tile_t = min(Tp, max_t)
    tile_c = _TARGET_BLOCK_BYTES // (tile_t * itemsize)
    tile_c = max(sl, (tile_c // sl) * sl)
    tile_c = min(tile_c, _round_up(C, sl))
    return tile_c, tile_t


def _normalize_tiled(dat, *, tile_c=None, tile_t=None):
    C, T = dat.shape
    dt = jnp.dtype(dat.dtype)
    sl = _sublane(dt)
    if tile_c is None or tile_t is None:
        auto_c, auto_t = _choose_tiles(C, T, dt.itemsize, sl)
        tile_c = tile_c if tile_c is not None else auto_c
        tile_t = tile_t if tile_t is not None else auto_t

    nc = pl.cdiv(C, tile_c)
    nt = pl.cdiv(T, tile_t)
    mask_c = (C % tile_c) != 0
    mask_t = (T % tile_t) != 0

    # Pass 1: per-C-block abs-max partials.  Each C block owns one (1,8,128)
    # output tile (kept (8,128)-aligned), revisited across the T axis.
    absmax_kernel = functools.partial(
        _absmax_kernel, C=C, T=T, tile_c=tile_c, tile_t=tile_t,
        mask_c=mask_c, mask_t=mask_t)
    partials = pl.pallas_call(
        absmax_kernel,
        out_shape=jax.ShapeDtypeStruct((nc, 8, _LANE), jnp.float32),
        grid=(nc, nt),
        in_specs=[pl.BlockSpec((tile_c, tile_t), lambda c, t: (c, t))],
        out_specs=pl.BlockSpec((1, 8, _LANE), lambda c, t: (c, 0, 0)),
        compiler_params=pltpu.CompilerParams(
            dimension_semantics=("parallel", "arbitrary")),
    )(dat)

    # Exact scalar reciprocal (tiny XLA op), shipped to pass 2 via SMEM.
    inv = jnp.reshape(1.0 / jnp.max(partials), (1,)).astype(jnp.float32)

    # Pass 2: independent blocks -> both axes "parallel" (megacore-friendly).
    return pl.pallas_call(
        _scale_kernel,
        out_shape=jax.ShapeDtypeStruct((C, T), dat.dtype),
        grid=(nc, nt),
        in_specs=[
            pl.BlockSpec(memory_space=pltpu.MemorySpace.SMEM),
            pl.BlockSpec((tile_c, tile_t), lambda c, t: (c, t)),
        ],
        out_specs=pl.BlockSpec((tile_c, tile_t), lambda c, t: (c, t)),
        compiler_params=pltpu.CompilerParams(
            dimension_semantics=("parallel", "parallel")),
    )(inv, dat)


# -----------------------------------------------------------------------------
# Wrapper (jit-friendly; all shape logic is static at trace time).
# -----------------------------------------------------------------------------
def _normalize_2d(dat):
    C, T = dat.shape
    itemsize = jnp.dtype(dat.dtype).itemsize
    vmem_cap = _vmem_capacity_bytes()
    fused_elems_limit = int(vmem_cap * _FUSED_VMEM_FRACTION) // _FUSED_BYTES_PER_ELEM
    if C * T <= fused_elems_limit:
        return _normalize_fused(dat)
    del itemsize  # tile choice handles dtype internally
    return _normalize_tiled(dat)


@jax.jit
def normalize(csi):
    """JAX/Pallas equivalent of Normalize().forward(csi)."""
    dat = jnp.squeeze(csi)          # matches csi.squeeze() in the module
    if dat.ndim != 2:
        # The PyTorch module also assumes a 2-D result after squeeze().
        raise ValueError(f"Normalize expects a (C, T) tensor after squeeze, "
                         f"got shape {dat.shape}")
    C, T = dat.shape
    out = _normalize_2d(dat)
    return jnp.reshape(out, (1, C, T))


if __name__ == "__main__":
    key = jax.random.PRNGKey(0)
    k1, k2, k3 = jax.random.split(key, 3)

    # 1) Canonical CSI-like input (1, C=8, T=128) -> fused single-block path.
    C, T = 8, 128
    csi = jax.random.normal(k1, (1, C, T), dtype=jnp.float32)
    out = jax.block_until_ready(normalize(csi))
    assert out.shape == (1, C, T), out.shape
    assert out.dtype == csi.dtype
    dat = jnp.squeeze(csi)
    ref = jnp.reshape(dat / jnp.max(jnp.abs(dat)), (1, C, T))
    assert jnp.allclose(out, ref, rtol=1e-6, atol=1e-6)

    # 2) Non-(8,128)-aligned input -> fused path with block == full dims
    #    (no padding, no slicing).
    csi2 = jax.random.normal(k2, (1, 6, 100), dtype=jnp.float32)
    out2 = jax.block_until_ready(normalize(csi2))
    dat2 = jnp.squeeze(csi2)
    ref2 = jnp.reshape(dat2 / jnp.max(jnp.abs(dat2)), (1, 6, 100))
    assert jnp.allclose(out2, ref2, rtol=1e-6, atol=1e-6)

    # 3) Exercise the tiled two-pass path with forced small tiles and ragged
    #    edges in both dims (in-kernel masking + SMEM-scalar scale).
    dat3 = jax.random.normal(k3, (20, 300), dtype=jnp.float32)
    out3 = jax.block_until_ready(_normalize_tiled(dat3, tile_c=8, tile_t=128))
    ref3 = dat3 / jnp.max(jnp.abs(dat3))
    assert out3.shape == dat3.shape
    assert jnp.allclose(out3, ref3, rtol=1e-6, atol=1e-6)

    print("KERNEL_OK")
</pallas_src>

<mosaic_0001>
module attributes {stable_mosaic.version = 11 : i64} {
  func.func @_normalize_fused_kernel(%arg0: memref<8x128xf32, #tpu.memory_space<vmem>>, %arg1: memref<8x128xf32, #tpu.memory_space<vmem>>) attributes {dimension_semantics = [], scalar_prefetch = 0 : i64, scratch_operands = 0 : i64, tpu.core_type = #tpu.core_type<tc>} {
    %c0 = arith.constant 0 : index
    %c0_0 = arith.constant 0 : index
    %0 = vector.load %arg0[%c0, %c0_0] : memref<8x128xf32, #tpu.memory_space<vmem>>, vector<8x128xf32>
    %1 = math.absf %0 : vector<8x128xf32>
    %2 = vector.shape_cast %1 : vector<8x128xf32> to vector<1x8x128xf32>
    %cst = arith.constant dense<0xFF800000> : vector<1xf32>
    %3 = vector.multi_reduction <maximumf>, %2, %cst [1, 2] : vector<1x8x128xf32> to vector<1xf32>
    %4 = vector.shape_cast %3 : vector<1xf32> to vector<1x1x1xf32>
    %5 = vector.extract %4[0, 0, 0] : f32 from vector<1x1x1xf32>
    %cst_1 = arith.constant 1.000000e+00 : f32
    %6 = arith.divf %cst_1, %5 : f32
    %7 = vector.broadcast %6 : f32 to vector<8x128xf32>
    %8 = arith.mulf %0, %7 : vector<8x128xf32>
    %c0_2 = arith.constant 0 : index
    %c0_3 = arith.constant 0 : index
    %9 = vector.load %arg1[%c0_2, %c0_3] : memref<8x128xf32, #tpu.memory_space<vmem>>, vector<8x128xf32>
    tpu.vector_store %arg1[%c0_2, %c0_3], %8 {strides = array<i32>} : memref<8x128xf32, #tpu.memory_space<vmem>>, vector<8x128xf32>,
    return
  }
}

</mosaic_0001>

<bundles_post_ra>
// kernel: normalize.1
= control target key start
LH: loop header
LB: loop body
LE: loop exit
PB: predicated region body
PF: predicated region fallthrough
CT: control target
= control target key end

     0   :  { %6 = vsyncpa [#allocation3], 0  ;;  %s145_s0 = inlined_call_operand.hbm [shape: f32[8,128], index: 0, kind: input, shape index: {}]   ;;  %s146_s1 = inlined_call_operand.hbm [shape: f32[8,128], index: 1, kind: output, shape index: {}]  }
   0x1   :  { %7 = vsyncpa [#allocation4], 0  ;;  %s109_s6 = smov [#allocation2]   ;;  %s61_s10 = scalar_lea.hbm %s145_s0, 128 }
   0x2   :  { %s14_s7 = sshll.u32 %s109_s6, 4  ;;  %p62_p0 = scmp.ne.s32.totalorder %s145_s0, %s61_s10  ;;  %s15_s7 = int_to_ptr.vmem [resolvable:$true] %s14_s7 }
   0x3   :  { %p65_p1 = scmp.lt.u32.totalorder %s61_s10, %s145_s0 }
   0x5   :  { %p67_p2 = pnand %p65_p1, %p62_p0 }
   0x7   :  { %70 = shalt.err (!%p67_p2)
}
   0x8   :  { %s71_s15 = scalar_lea.vmem %s15_s7, 128  ;;  %p76_p4 = scmp.lt.s32.totalorder %s15_s7, %s15_s7 }
   0x9   :  { %p72_p3 = scmp.ne.s32.totalorder %s15_s7, %s71_s15  ;;  %p77_p5 = scmp.lt.s32.totalorder %s71_s15, %s71_s15 }
   0xb   :  { %p78_p6 = por %p77_p5, %p76_p4 }
   0xd   :  { %p79_p7 = pnand %p78_p6, %p72_p3 }
   0xf   :  { %82 = shalt.err (!%p79_p7)
}
  0x10   :  { %17 = dma.hbm_to_vmem [thread:$0]  %s145_s0, 128, %s15_s7, [#allocation3]  }
  0x11   :  { %105 = dma.done.wait [#allocation3], 128  }
  0x12   :  { %106 = vsyncadd [#allocation3], 4294967168  ;;  %v21_v0 = vld [vmem:[#allocation2] sm:$0xff]  ;;  %s110_s19 = smov [#allocation5]  }
  0x13   :  { %v22_v1 = vand.u32 2147483647, %v21_v0  ;;  %s44_s0 = sshll.u32 %s110_s19, 4  ;;  %s45_s0 = int_to_ptr.vmem [resolvable:$true] %s44_s0 }
  0x14   :  { %s83_s21 = scalar_lea.vmem %s45_s0, 128  ;;  %p88_p9 = scmp.lt.s32.totalorder %s45_s0, %s45_s0 }
  0x15   :  { %23 = vmax.xlane.f32.xlu0 %v22_v1  ;;  %p84_p8 = scmp.ne.s32.totalorder %s45_s0, %s83_s21  ;;  %p89_p10 = scmp.lt.s32.totalorder %s83_s21, %s83_s21 }
  0x17   :  { %p90_p11 = por %p89_p10, %p88_p9 }
  0x19   :  { %p91_p12 = pnand %p90_p11, %p84_p8 }
  0xa2   :  { %v24_v2 = vpop.xlane.xlu0 %23 }
  0xa3   :  { %v25_v3 = vrot.slane %v24_v2, 4 }
  0xa5   :  { %v26_v4 = vmax.f32 %v24_v2, %v25_v3 }
  0xa7   :  { %v27_v5 = vrot.slane %v26_v4, 2 }
  0xa9   :  { %v28_v6 = vmax.f32 %v26_v4, %v27_v5 }
  0xab   :  { %v29_v7 = vrot.slane %v28_v6, 1 }
  0xad   :  { %v30_v8 = vmax.f32 %v28_v6, %v29_v7 }
  0xaf   :  { %53 = vpush %v30_v8 }
  0xe0   :  { %s54_s18 = spop %53 }
  0xe1   :  { %v32_v9 = vstv %s54_s18 }
  0xe2   :  { %59 = vrcp.f32 %v32_v9 }
  0xec   :  { %v60_v10 = vpop.eup %59 }
  0xed   :  { %55 = vpush %v60_v10 }
 0x11e   :  { %s56_s20 = spop %55 }
 0x11f   :  { %v35_v11 = vstv %s56_s20 }
 0x120   :  { %v36_v12 = vmul.f32 %v35_v11, %v21_v0 }
 0x122   :  { %37 = vst [vmem:[#allocation5] sm:$0xff] %v36_v12 }
 0x123   :  { %94 = shalt.err (!%p91_p12)
}
 0x124   :  { %s95_s24 = scalar_lea.hbm %s146_s1, 128 }
 0x125   :  { %p96_p13 = scmp.ne.s32.totalorder %s146_s1, %s95_s24  ;;  %p99_p0 = scmp.lt.u32.totalorder %s95_s24, %s146_s1 }
 0x127   :  { %p101_p1 = pnand %p99_p0, %p96_p13 }
 0x129   :  { %104 = shalt.err (!%p101_p1)
}
 0x12a   :  { %47 = dma.vmem_to_hbm [thread:$0]  %s45_s0, 128, %s146_s1, [#allocation4]  }
 0x12b   :  { %107 = dma.done.wait [#allocation4], 128  }
 0x12c   :  { %108 = vsyncadd [#allocation4], 4294967168 }
 0x12d   :  { %51 = vsyncpa [#allocation3], 1 }
 0x12e   :  { %52 = vsyncpa [#allocation4], 1 }

</bundles_post_ra>
